<compile_context>
chip_gen: v7x
topology: tpu7x:2x2x1
jax: 0.10.0
libtpu: 0.0.40
codegen_flags: <defaults>
</compile_context>

<pallas_src>
import jax
import jax.numpy as jnp
from jax import lax
from jax.experimental import pallas as pl
from jax.experimental.pallas import tpu as pltpu


def se_block(x, w1, b1, w2, b2):
    """x: (B, C, H, W).  w1: (Cr, C), b1: (Cr,), w2: (C, Cr), b2: (C,)
    (PyTorch nn.Linear weight layout: (out_features, in_features)).
    Output dtype follows x; all in-kernel math is f32."""
    B, C, H, W = x.shape
    Cr = w1.shape[0]
    HW = H * W

    # Lane-dense layout: pad the spatial (lane) axis to a multiple of 128.
    HW_pad = pl.cdiv(HW, 128) * 128
    LANE_CHUNK = 1024
    if HW_pad > LANE_CHUNK:
        HW_pad = pl.cdiv(HW_pad, LANE_CHUNK) * LANE_CHUNK
        chunk = LANE_CHUNK
    else:
        chunk = HW_pad
    n_chunks = HW_pad // chunk
    inv_hw = 1.0 / float(HW)           # mean uses the TRUE spatial size

    x_flat = x.reshape(B, C, HW)
    if HW_pad != HW:
        x_flat = jnp.pad(x_flat, ((0, 0), (0, 0), (0, HW_pad - HW)))

    # Parameters arranged so the kernel needs no transposes:
    #   w1t: (C, Cr)  -> h[r] = sum_c w1t[c, r] * y[c]   (sublane reduce)
    #   w2 : (C, Cr)  -> s[c] = sum_r w2[c, r] * h[r]    (lane reduce)
    w1t = jnp.asarray(w1, jnp.float32).T            # (C, Cr)
    w2f = jnp.asarray(w2, jnp.float32)              # (C, Cr)  (original layout)
    b1r = jnp.asarray(b1, jnp.float32).reshape(1, Cr)
    b2c = jnp.asarray(b2, jnp.float32).reshape(C, 1)

    def kernel(x_ref, w1t_ref, b1_ref, w2_ref, b2_ref, o_ref):
        # x_ref / o_ref: (C, HW_pad) -- batch dim squeezed by the BlockSpec.

        # ---- Squeeze: chunked global-average pool over the lane axis -> (C, 1)
        def pool_body(i, acc):
            start = pl.multiple_of(i * chunk, 128)
            xc = x_ref[:, pl.ds(start, chunk)].astype(jnp.float32)
            return acc + jnp.sum(xc, axis=-1, keepdims=True)

        y = lax.fori_loop(0, n_chunks, pool_body,
                          jnp.zeros((C, 1), jnp.float32)) * inv_hw     # (C, 1)

        # ---- Excite: two tiny matvecs on VPU/XLU (no MXU, no transposes)
        h = jnp.sum(w1t_ref[...] * y, axis=0, keepdims=True) + b1_ref[...]   # (1, Cr)
        h = jnp.where(h >= 0, h, 0.1 * h)                                    # LeakyReLU(0.1)
        s = jnp.sum(w2_ref[...] * h, axis=-1, keepdims=True) + b2_ref[...]   # (C, 1)
        gate = jax.nn.sigmoid(s)                                             # (C, 1)

        # ---- Scale: chunked broadcast multiply, lane-dense stores
        def scale_body(i, carry):
            start = pl.multiple_of(i * chunk, 128)
            xc = x_ref[:, pl.ds(start, chunk)].astype(jnp.float32)
            o_ref[:, pl.ds(start, chunk)] = (xc * gate).astype(o_ref.dtype)
            return carry

        lax.fori_loop(0, n_chunks, scale_body, 0)

    # Explicit VMEM budget: in + out slabs are each double-buffered.
    itemsize = jnp.dtype(x.dtype).itemsize
    slab_bytes = C * HW_pad * itemsize
    param_bytes = (2 * C * Cr + Cr + C) * 4
    vmem_need = 4 * slab_bytes + 2 * param_bytes + (2 << 20)
    vmem_limit = max(int(vmem_need), 16 << 20)

    out = pl.pallas_call(
        kernel,
        out_shape=jax.ShapeDtypeStruct((B, C, HW_pad), x.dtype),
        grid_spec=pltpu.PrefetchScalarGridSpec(
            num_scalar_prefetch=0,
            grid=(B,),
            in_specs=[
                pl.BlockSpec((None, C, HW_pad), lambda b: (b, 0, 0)),  # x slab
                pl.BlockSpec((C, Cr), lambda b: (0, 0)),               # w1^T (resident)
                pl.BlockSpec((1, Cr), lambda b: (0, 0)),               # b1 row
                pl.BlockSpec((C, Cr), lambda b: (0, 0)),               # w2 (resident)
                pl.BlockSpec((C, 1), lambda b: (0, 0)),                # b2 col
            ],
            out_specs=pl.BlockSpec((None, C, HW_pad), lambda b: (b, 0, 0)),
        ),
        compiler_params=pltpu.CompilerParams(
            dimension_semantics=("parallel",),
            vmem_limit_bytes=vmem_limit,
        ),
    )(x_flat, w1t, b1r, w2f, b2c)

    return out[..., :HW].reshape(B, C, H, W)


def _reference(x, w1, b1, w2, b2):
    # Pure-JAX reference mirroring the PyTorch forward (f32, exact matmuls).
    xf = x.astype(jnp.float32)
    y = jnp.mean(xf, axis=(2, 3))                                           # (B, C)
    h = jnp.dot(y, w1.T, precision=jax.lax.Precision.HIGHEST) + b1
    h = jnp.where(h >= 0, h, 0.1 * h)
    s = jax.nn.sigmoid(jnp.dot(h, w2.T, precision=jax.lax.Precision.HIGHEST) + b2)
    return xf * s[:, :, None, None]


if __name__ == "__main__":
    # Small shapes consistent with the module: channel=32, reduction=16 -> Cr=2
    B, C, H, W = 2, 32, 16, 16
    reduction = 16
    Cr = C // reduction

    key = jax.random.PRNGKey(0)
    kx, k1, k2, k3, k4 = jax.random.split(key, 5)

    x = jax.random.normal(kx, (B, C, H, W), dtype=jnp.float32)
    w1 = jax.random.normal(k1, (Cr, C), dtype=jnp.float32) * 0.1
    b1 = jax.random.normal(k2, (Cr,), dtype=jnp.float32) * 0.1
    w2 = jax.random.normal(k3, (C, Cr), dtype=jnp.float32) * 0.1
    b2 = jax.random.normal(k4, (C,), dtype=jnp.float32) * 0.1

    # f32 path
    out = jax.block_until_ready(se_block(x, w1, b1, w2, b2))
    ref = _reference(x, w1, b1, w2, b2)
    assert out.shape == (B, C, H, W)
    assert jnp.allclose(out, ref, atol=2e-5, rtol=2e-5), "f32 mismatch vs reference"

    # bf16 I/O path (halves HBM traffic on v6e/v7x); compute stays f32 in-kernel.
    x_bf16 = x.astype(jnp.bfloat16)
    out_bf = jax.block_until_ready(se_block(x_bf16, w1, b1, w2, b2))
    ref_bf = _reference(x_bf16, w1, b1, w2, b2)
    assert out_bf.dtype == jnp.bfloat16
    assert jnp.allclose(out_bf.astype(jnp.float32), ref_bf, atol=2e-2, rtol=2e-2), \
        "bf16 mismatch vs reference"

    print("KERNEL_OK")
</pallas_src>

<mosaic_0001>
module attributes {stable_mosaic.version = 11 : i64} {
  func.func @kernel(%arg0: i32, %arg1: memref<1x32x256xf32, #tpu.memory_space<vmem>>, %arg2: memref<32x2xf32, #tpu.memory_space<vmem>>, %arg3: memref<1x2xf32, #tpu.memory_space<vmem>>, %arg4: memref<32x2xf32, #tpu.memory_space<vmem>>, %arg5: memref<32x1xf32, #tpu.memory_space<vmem>>, %arg6: memref<1x32x256xf32, #tpu.memory_space<vmem>>) attributes {dimension_semantics = [#tpu.dimension_semantics<parallel>], iteration_bounds = array<i64: 2>, scalar_prefetch = 0 : i64, scratch_operands = 0 : i64, tpu.core_type = #tpu.core_type<tc>, window_params = [{transform_indices = @transform_0, window_bounds = array<i64: 1, 32, 256>}, {pipeline_mode = #tpu.pipeline_mode<synchronous>, transform_indices = @transform_1, window_bounds = array<i64: 32, 2>}, {pipeline_mode = #tpu.pipeline_mode<synchronous>, transform_indices = @transform_2, window_bounds = array<i64: 1, 2>}, {pipeline_mode = #tpu.pipeline_mode<synchronous>, transform_indices = @transform_3, window_bounds = array<i64: 32, 2>}, {pipeline_mode = #tpu.pipeline_mode<synchronous>, transform_indices = @transform_4, window_bounds = array<i64: 32, 1>}, {transform_indices = @transform_5, window_bounds = array<i64: 1, 32, 256>}]} {
    %cst = arith.constant 0.000000e+00 : f32
    %0 = vector.broadcast %cst : f32 to vector<32x1xf32>
    %c0_i32 = arith.constant 0 : i32
    %c256_i32 = arith.constant 256 : i32
    %1 = arith.muli %c0_i32, %c256_i32 : i32
    %2 = tpu.assume_multiple %1, 128 : i32
    %c0 = arith.constant 0 : index
    %c0_0 = arith.constant 0 : index
    %3 = arith.index_cast %2 : i32 to index
    %4 = vector.load %arg1[%c0, %c0_0, %3] : memref<1x32x256xf32, #tpu.memory_space<vmem>>, vector<1x32x256xf32>
    %5 = vector.shape_cast %4 : vector<1x32x256xf32> to vector<32x256xf32>
    %cst_1 = arith.constant dense<0.000000e+00> : vector<32xf32>
    %6 = vector.multi_reduction <add>, %5, %cst_1 [1] : vector<32x256xf32> to vector<32xf32>
    %7 = vector.shape_cast %6 : vector<32xf32> to vector<32x1xf32>
    %8 = arith.addf %0, %7 : vector<32x1xf32>
    %c1_i32 = arith.constant 1 : i32
    %cst_2 = arith.constant 3.906250e-03 : f32
    %9 = vector.broadcast %cst_2 : f32 to vector<32x1xf32>
    %10 = arith.mulf %8, %9 : vector<32x1xf32>
    %c0_3 = arith.constant 0 : index
    %c0_4 = arith.constant 0 : index
    %11 = vector.load %arg2[%c0_3, %c0_4] : memref<32x2xf32, #tpu.memory_space<vmem>>, vector<32x2xf32>
    %12 = vector.broadcast %10 : vector<32x1xf32> to vector<32x2xf32>
    %13 = arith.mulf %11, %12 : vector<32x2xf32>
    %cst_5 = arith.constant dense<0.000000e+00> : vector<2xf32>
    %14 = vector.multi_reduction <add>, %13, %cst_5 [0] : vector<32x2xf32> to vector<2xf32>
    %15 = vector.shape_cast %14 : vector<2xf32> to vector<1x2xf32>
    %c0_6 = arith.constant 0 : index
    %c0_7 = arith.constant 0 : index
    %16 = vector.load %arg3[%c0_6, %c0_7] : memref<1x2xf32, #tpu.memory_space<vmem>>, vector<1x2xf32>
    %17 = arith.addf %15, %16 : vector<1x2xf32>
    %cst_8 = arith.constant 0.000000e+00 : f32
    %18 = vector.broadcast %cst_8 : f32 to vector<1x2xf32>
    %19 = arith.cmpf oge, %17, %18 : vector<1x2xf32>
    %cst_9 = arith.constant 1.000000e-01 : f32
    %20 = vector.broadcast %cst_9 : f32 to vector<1x2xf32>
    %21 = arith.mulf %20, %17 : vector<1x2xf32>
    %22 = arith.select %19, %17, %21 : vector<1x2xi1>, vector<1x2xf32>
    %c0_10 = arith.constant 0 : index
    %c0_11 = arith.constant 0 : index
    %23 = vector.load %arg4[%c0_10, %c0_11] : memref<32x2xf32, #tpu.memory_space<vmem>>, vector<32x2xf32>
    %24 = vector.broadcast %22 : vector<1x2xf32> to vector<32x2xf32>
    %25 = arith.mulf %23, %24 : vector<32x2xf32>
    %cst_12 = arith.constant dense<0.000000e+00> : vector<32xf32>
    %26 = vector.multi_reduction <add>, %25, %cst_12 [1] : vector<32x2xf32> to vector<32xf32>
    %27 = vector.shape_cast %26 : vector<32xf32> to vector<32x1xf32>
    %c0_13 = arith.constant 0 : index
    %c0_14 = arith.constant 0 : index
    %28 = vector.load %arg5[%c0_13, %c0_14] : memref<32x1xf32, #tpu.memory_space<vmem>>, vector<32x1xf32>
    %29 = arith.addf %27, %28 : vector<32x1xf32>
    %30 = arith.negf %29 : vector<32x1xf32>
    %31 = math.exp %30 : vector<32x1xf32>
    %cst_15 = arith.constant 1.000000e+00 : f32
    %32 = vector.broadcast %cst_15 : f32 to vector<32x1xf32>
    %33 = arith.addf %32, %31 : vector<32x1xf32>
    %34 = arith.divf %32, %33 : vector<32x1xf32>
    %c0_i32_16 = arith.constant 0 : i32
    %c256_i32_17 = arith.constant 256 : i32
    %35 = arith.muli %c0_i32_16, %c256_i32_17 : i32
    %36 = tpu.assume_multiple %35, 128 : i32
    %c0_18 = arith.constant 0 : index
    %c0_19 = arith.constant 0 : index
    %37 = arith.index_cast %36 : i32 to index
    %38 = vector.load %arg1[%c0_18, %c0_19, %37] : memref<1x32x256xf32, #tpu.memory_space<vmem>>, vector<1x32x256xf32>
    %39 = vector.shape_cast %38 : vector<1x32x256xf32> to vector<32x256xf32>
    %40 = vector.broadcast %34 : vector<32x1xf32> to vector<32x256xf32>
    %41 = arith.mulf %39, %40 : vector<32x256xf32>
    %c0_20 = arith.constant 0 : index
    %c0_21 = arith.constant 0 : index
    %42 = arith.index_cast %36 : i32 to index
    %43 = vector.load %arg6[%c0_20, %c0_21, %42] : memref<1x32x256xf32, #tpu.memory_space<vmem>>, vector<1x32x256xf32>
    %44 = vector.shape_cast %43 : vector<1x32x256xf32> to vector<32x256xf32>
    %45 = vector.shape_cast %41 : vector<32x256xf32> to vector<1x32x256xf32>
    tpu.vector_store %arg6[%c0_20, %c0_21, %42], %45 {strides = array<i32>} : memref<1x32x256xf32, #tpu.memory_space<vmem>>, vector<1x32x256xf32>,
    %c1_i32_22 = arith.constant 1 : i32
    return
  }
  func.func @transform_0(%arg0: i32) -> (i32, i32, i32) {
    %c0_i32 = arith.constant 0 : i32
    %c0_i32_0 = arith.constant 0 : i32
    %c0_i32_1 = arith.constant 0 : i32
    return %arg0, %c0_i32, %c0_i32_0 : i32, i32, i32
  }
  func.func @transform_1(%arg0: i32) -> (i32, i32) {
    %c0_i32 = arith.constant 0 : i32
    %c0_i32_0 = arith.constant 0 : i32
    %c0_i32_1 = arith.constant 0 : i32
    return %c0_i32, %c0_i32_0 : i32, i32
  }
  func.func @transform_2(%arg0: i32) -> (i32, i32) {
    %c0_i32 = arith.constant 0 : i32
    %c0_i32_0 = arith.constant 0 : i32
    %c0_i32_1 = arith.constant 0 : i32
    return %c0_i32, %c0_i32_0 : i32, i32
  }
  func.func @transform_3(%arg0: i32) -> (i32, i32) {
    %c0_i32 = arith.constant 0 : i32
    %c0_i32_0 = arith.constant 0 : i32
    %c0_i32_1 = arith.constant 0 : i32
    return %c0_i32, %c0_i32_0 : i32, i32
  }
  func.func @transform_4(%arg0: i32) -> (i32, i32) {
    %c0_i32 = arith.constant 0 : i32
    %c0_i32_0 = arith.constant 0 : i32
    %c0_i32_1 = arith.constant 0 : i32
    return %c0_i32, %c0_i32_0 : i32, i32
  }
  func.func @transform_5(%arg0: i32) -> (i32, i32, i32) {
    %c0_i32 = arith.constant 0 : i32
    %c0_i32_0 = arith.constant 0 : i32
    %c0_i32_1 = arith.constant 0 : i32
    return %arg0, %c0_i32, %c0_i32_0 : i32, i32, i32
  }
}

</mosaic_0001>

<bundles_post_ra>
// kernel: tpu_custom_call.1
= control target key start
LH: loop header
LB: loop body
LE: loop exit
PB: predicated region body
PF: predicated region fallthrough
CT: control target
= control target key end

     0   :  { %10 = vsyncpa [#allocation3], 0  ;;  %s946_s0 = inlined_call_operand.hbm [shape: f32[2,32,256], index: 0, kind: input, shape index: {}]   ;;  %s947_s1 = inlined_call_operand.vmem [shape: f32[32,2], index: 1, kind: input, shape index: {}]   ;;  %s948_s2 = inlined_call_operand.vmem [shape: f32[1,2], index: 2, kind: input, shape index: {}]   ;;  %s949_s3 = inlined_call_operand.vmem [shape: f32[32,2], index: 3, kind: input, shape index: {}]   ;;  %s950_s4 = inlined_call_operand.vmem [shape: f32[32,1], index: 4, kind: input, shape index: {}]   ;;  %s951_s5 = inlined_call_operand.hbm [shape: f32[2,32,256], index: 5, kind: output, shape index: {}]  }
   0x1   :  { %12 = vsyncpa [#allocation3 + $0x1], 0 }
   0x2   :  { %13 = vsyncpa [#allocation4], 0 }
   0x3   :  { %15 = vsyncpa [#allocation4 + $0x1], 0  ;;  %s701_s18 = smov 0   ;;  %s703_s19 = smov 0  }
   0x4   :  { %s705_s20 = smov 0   ;;  %s707_s21 = smov 0  }
   0x5 LB: > { %s722_s22 = sadd.s32 4294967295, %s662_s21   ;;  %s477_s23 = sadd.s32 4294967294, %s662_s21   ;;  %s662_s21 = sphi %s707_s21, %s964_s21   ;;  %s658_s20 = sphi %s705_s20, %s963_s20   ;;  %s654_s19 = sphi %s703_s19, %s962_s19   ;;  %s650_s18 = sphi %s701_s18, %s961_s18  }
   0x6   : > { %s726_s24 = sadd.s32 1, %s662_s21   ;;  %s28_s25 = sadd.s32 1, %s658_s20 }
   0x7   : > { %s25_s26 = ssub.s32 %s662_s21, %s726_s24  ;;  %p35_p0 = scmp.ne.s32.totalorder %s658_s20, %s654_s19 }
   0x8   : > { %p26_p1 = scmp.eq.s32.totalorder %s25_s26, 0  ;;  %p36_p2 = scmp.eq.s32.totalorder %s662_s21, 0 }
   0x9   : > { %p41_p3 = scmp.ne.s32.totalorder %s654_s19, %s650_s18  ;;  %p42_p4 = scmp.eq.s32.totalorder %s722_s22, 0 }
   0xa   : > { %s738_s27 = scalar_select %p26_p1, %s658_s20, %s28_s25  }
   0xb   : > { %p740_p5 = por %p36_p2, %p35_p0  ;;  %p744_p6 = por %p42_p4, %p41_p3 }
   0xc   : > { %p149_p7 = scmp.eq.s32.totalorder %s722_s22, 1  ;;  %p155_p8 = scmp.eq.s32.totalorder %s477_s23, 1 }
   0xd   : > { %p509_p10 = scmp.lt.s32.totalorder %s662_s21, 2  ;;  %s187_s7 = sand.u32 1, %s658_s20  }
   0xe   : > { %p751_p11 = por %p149_p7, %p35_p0  ;;  %p755_p12 = por %p155_p8, %p41_p3 }
   0xf   : > { %s495_s8 = sshll.u32 %s662_s21, 10  ;;  %s480_s9 = sshll.u32 %s187_s7, 6 }
  0x10   : > { %s955_s30 = scalar_select %p751_p11, 1, 0 }
  0x11   : > { %s956_s6 = scalar_select %p755_p12, 1, 0 }
  0x12   : > { %s764_s12 = scalar_lea.hbm %s946_s0, %s495_s8  ;;  %s191_s13 = scalar_lea.vmem [#allocation2], %s480_s9 }
  0x13   : > { %s198_s14 = sshll.u32 %s191_s13, 4  ;;  %p768_p13 = pnand %p509_p10, %p740_p5  ;;  %s772_s14 = int_to_ptr.vmem [resolvable:$true] %s198_s14 }
  0x14   : > { %s774_s16 = scalar_lea.sflag [#allocation3], %s187_s7  ;;  %s566_s17 = scalar_lea.hbm %s764_s12, 1024 }
  0x15   : > { %p567_p0 = scmp.ne.s32.totalorder %s764_s12, %s566_s17  ;;  %p568_p1 = pneg %p768_p13 }
  0x16   : > { %s571_s26 = scalar_lea.hbm %s946_s0, 2048  ;;  %p572_p4 = scmp.lt.u32.totalorder %s764_s12, %s946_s0 }
  0x17   : > { %p569_p2 = pnand %p568_p1, %p567_p0  ;;  %p573_p5 = scmp.lt.u32.totalorder %s571_s26, %s566_s17 }
  0x18   : > { %p575_p8 = scmp.lt.u32.totalorder %s566_s17, %s764_s12 }
  0x19   : > { %p570_p3 = pneg %p569_p2  ;;  %p574_p7 = por %p573_p5, %p572_p4 }
  0x1b   : > { %p576_p10 = por %p575_p8, %p574_p7 }
  0x1d   : > { %p577_p9 = pnand %p576_p10, %p570_p3 }
  0x1f   : > { %580 = shalt.err (!%p577_p9)
}
  0x20   : > { %s581_s7 = scalar_lea.vmem %s772_s14, 1024  ;;  %s664_s9 = smov [#allocation2]  }
  0x21   : > { %p582_p0 = scmp.ne.s32.totalorder %s772_s14, %s581_s7  ;;  %s586_s10 = sshll.u32 %s664_s9, 4  ;;  %s587_s10 = int_to_ptr.vmem [resolvable:$false] %s586_s10 }
  0x22   : > { %s588_s11 = scalar_lea.vmem %s587_s10, 2048  ;;  %p589_p11 = scmp.lt.s32.totalorder %s772_s14, %s587_s10 }
  0x23   : > { %p584_p2 = pnand %p582_p0, %p568_p1  ;;  %p590_p4 = scmp.lt.s32.totalorder %s588_s11, %s581_s7 }
  0x25   : > { %p585_p12 = pneg %p584_p2  ;;  %p591_p5 = por %p590_p4, %p589_p11 }
  0x27   : > { %p592_p7 = pnand %p591_p5, %p585_p12 }
  0x29   : > { %595 = shalt.err (!%p592_p7)
}
  0x2a   : > { %s665_s13 = smov 256   ;;  %s666_s17 = smov 16  }
  0x2b   : > { %504 = dma.hbm_to_vmem [thread:$0]  (!%p768_p13), %s764_s12, 1024, %s772_s14, %s774_s16, %s665_s13, %s665_s13, %s666_s17  }
  0x2c   : > { %p483_p9 = scmp.ge.s32.totalorder %s662_s21, 1  ;;  %p206_p1 = scmp.lt.s32.totalorder %s662_s21, 3 }
  0x2e   : > { %p207_p3 = pnand %p483_p9, %p206_p1 }
  0x2f   : > { %s805_s23 = sand.u32 (!%p207_p3), 1, %s654_s19  }
  0x30   : > { %210 = sbr.rel (%p207_p3) target bundleno = 562 (0x232), region = 40  ;;  %s484_s25 = sshll.u32 (!%p207_p3), %s805_s23, 6 }
  0x31   : > { %s213_s26 = scalar_lea.sflag (!%p207_p3), [#allocation3], %s805_s23  ;;  %s216_s28 = scalar_lea.vmem (!%p207_p3), [#allocation2], %s484_s25 }
  0x37   : > { %641 = dma.done.wait (%p744_p6), %s213_s26, 1024  }
  0x38   : > { %643 = vsyncadd (%p744_p6), %s213_s26, 4294966272  ;;  %v815_v0 = vld [vmem:[%s216_s28] sm:$0xff]  ;;  %v817_v1 = vld [vmem:[%s216_s28 + $0x8] sm:$0xff]  ;;  %vm279_vm0 = vcmask 15360   ;;  %v302_v38 = vlaneseq  ;;  %v667_v61 = vmov 0   ;;  %s242_s26 = scalar_lea.vmem [#allocation5], %s484_s25 }
  0x39   : > { %v819_v2 = vld [vmem:[%s216_s28 + $0x20] sm:$0xff]  ;;  %v251_v3 = vadd.f32 %v817_v1, %v815_v0  ;;  %v823_v4 = vld [vmem:[%s216_s28 + $0x28] sm:$0xff]  ;;  %v825_v5 = vld [vmem:[%s216_s28 + $0x10] sm:$0xff]  ;;  %549 = vset.pattern.permute.xlu1 %v667_v61  ;;  %548 = vset.pattern.permute.xlu0 %v667_v61  ;;  %s496_s29 = sshll.u32 %s722_s22, 10  ;;  %s391_s22 = scalar_lea.sflag [#allocation4], %s805_s23 }
  0x3a   : > { %v827_v6 = vld [vmem:[%s216_s28 + $0x18] sm:$0xff]  ;;  %v257_v7 = vadd.f32 %v823_v4, %v819_v2  ;;  %v831_v8 = vld [vmem:[%s216_s28 + $0x30] sm:$0xff]  ;;  %v271_v15 = vld [vmem:[%s947_s1] sm:$0xff]  ;;  %v303_v42 = vshrl.u32 %v302_v38, 7  ;;  %s900_s14 = scalar_lea.hbm %s951_s5, %s496_s29  ;;  %p958_p11 = scmp.ne.s32.totalorder %s955_s30, 0 }
  0x3b   : > { %v833_v9 = vld [vmem:[%s216_s28 + $0x38] sm:$0xff]  ;;  %252 = vadd.xlane.f32.xlu0 %v251_v3  ;;  %v254_v10 = vadd.f32 %v827_v6, %v825_v5  ;;  %v273_v17 = vld [vmem:[%s947_s1 + $0x10] sm:$0xff]  ;;  %v272_v18 = vld [vmem:[%s947_s1 + $0x8] sm:$0xff]  ;;  %s404_s28 = sshll.u32 %s242_s26, 4  ;;  %s668_s16 = smov [#allocation5]   ;;  %s895_s28 = int_to_ptr.vmem [resolvable:$true] %s404_s28 }
  0x3c   : > { %258 = vadd.xlane.f32.xlu1 %v257_v7  ;;  %v260_v11 = vadd.f32 %v833_v9, %v831_v8  ;;  %v274_v22 = vld [vmem:[%s947_s1 + $0x18] sm:$0xff]  ;;  %v293_v41 = vld [vmem:[%s948_s2] sm:$0x1]  ;;  %v304_v45 = vsub.s32 0, %v303_v42  ;;  %v299_v48 = vld [vmem:[%s949_s3 + $0x8] sm:$0xff]  ;;  %s596_s15 = scalar_lea.vmem %s895_s28, 1024 }
  0x3d   : > { %v298_v49 = vld [vmem:[%s949_s3] sm:$0xff]  ;;  %v301_v51 = vld [vmem:[%s949_s3 + $0x18] sm:$0xff]  ;;  %v300_v52 = vld [vmem:[%s949_s3 + $0x10] sm:$0xff]  ;;  %p597_p6 = scmp.ne.s32.totalorder %s895_s28, %s596_s15  ;;  %s600_s8 = sshll.u32 %s668_s16, 4  ;;  %s601_s8 = int_to_ptr.vmem [resolvable:$false] %s600_s8 }
  0x3e   : > { %v323_v62 = vld [vmem:[%s950_s4 + $0x8] sm:$0xff]  ;;  %v322_v63 = vld [vmem:[%s950_s4] sm:$0xff]  ;;  %s602_s7 = scalar_lea.vmem %s601_s8, 2048  ;;  %p603_p8 = scmp.lt.s32.totalorder %s895_s28, %s601_s8 }
  0x3f   : > { %255 = vadd.xlane.f32.xlu0 %v254_v10  ;;  %p598_p12 = pnand %p597_p6, %p958_p11  ;;  %p604_p10 = scmp.lt.s32.totalorder %s602_s7, %s596_s15 }
  0x40   : > { %261 = vadd.xlane.f32.xlu1 %v260_v11 }
  0x41   : > { %p599_p13 = pneg %p598_p12  ;;  %p605_p0 = por %p604_p10, %p603_p8 }
  0x43   : > { %p606_p2 = pnand %p605_p0, %p599_p13 }
  0xc8   : > { %v253_v12 = vpop.xlane.xlu0 %252 }
  0xc9   : > { %v267_v13 = vmul.f32 0.00390625, %v253_v12  ;;  %v259_v14 = vpop.xlane.xlu1 %258  ;;  %v325_v12 = vld [vmem:[%s950_s4 + $0x18] sm:$0xff] }
  0xca   : > { %v269_v16 = vmul.f32 0.00390625, %v259_v14 }
  0xcb   : > { %v275_v20 = vmul.f32 %v271_v15, %v267_v13  ;;  %v324_v13 = vld [vmem:[%s950_s4 + $0x10] sm:$0xff] }
  0xcc   : > { %v256_v19 = vpop.xlane.xlu0 %255  ;;  %v277_v25 = vmul.f32 %v273_v17, %v269_v16 }
  0xcd   : > { %v268_v21 = vmul.f32 0.00390625, %v256_v19  ;;  %v262_v23 = vpop.xlane.xlu1 %261  ;;  %v280_v28 = vsel %vm279_vm0, %v275_v20, 0.0 }
  0xce   : > { %v270_v24 = vmul.f32 0.00390625, %v262_v23  ;;  %v283_v31 = vsel %vm279_vm0, %v277_v25, 0.0 }
  0xcf   : > { %v276_v26 = vmul.f32 %v272_v18, %v268_v21 }
  0xd0   : > { %v278_v27 = vmul.f32 %v274_v22, %v270_v24 }
  0xd1   : > { %v281_v29 = vsel %vm279_vm0, %v276_v26, 0.0 }
  0xd2   : > { %v282_v30 = vadd.f32 %v281_v29, %v280_v28  ;;  %v285_v32 = vsel %vm279_vm0, %v278_v27, 0.0 }
  0xd4   : > { %v284_v33 = vadd.f32 %v283_v31, %v282_v30 }
  0xd6   : > { %v286_v34 = vadd.f32 %v285_v32, %v284_v33 }
  0xd8   : > { %v287_v35 = vrot.slane %v286_v34, 4 }
  0xda   : > { %v288_v36 = vadd.f32 %v287_v35, %v286_v34 }
  0xdc   : > { %v289_v37 = vrot.slane %v288_v36, 2 }
  0xde   : > { %v290_v39 = vadd.f32 %v289_v37, %v288_v36 }
  0xe0   : > { %v291_v40 = vrot.slane %v290_v39, 1 }
  0xe2   : > { %v292_v43 = vadd.f32 %v291_v40, %v290_v39 }
  0xe4   : > { %v294_v44 = vadd.f32 %v293_v41, %v292_v43 }
  0xe6   : > { %vm295_vm1 = vcmp.ge.f32.partialorder %v294_v44, 0.0  ;;  %v296_v46 = vmul.f32 0.1, %v294_v44 }
  0xe8   : > { %v297_v47 = vsel %vm295_vm1, %v294_v44, %v296_v46 }
  0xe9   : > { %v305_v50 = vrot.slane %v297_v47, %v304_v45 }
  0xeb   : > { %v307_v53 = vmul.f32 %v305_v50, %v299_v48  ;;  %v306_v54 = vmul.f32 %v305_v50, %v298_v49  ;;  %v309_v57 = vmul.f32 %v305_v50, %v301_v51  ;;  %v308_v58 = vmul.f32 %v305_v50, %v300_v52 }
  0xed   : > { %v313_v55 = vsel %vm279_vm0, %v307_v53, 0.0  ;;  %v310_v56 = vsel %vm279_vm0, %v306_v54, 0.0  ;;  %v319_v59 = vsel %vm279_vm0, %v309_v57, 0.0  ;;  %v316_v60 = vsel %vm279_vm0, %v308_v58, 0.0 }
  0xee   : > { %314 = vadd.xlane.f32.xlu1 %v313_v55  ;;  %311 = vadd.xlane.f32.xlu0 %v310_v56 }
  0xf2   : > { %320 = vadd.xlane.f32.xlu1 %v319_v59  ;;  %317 = vadd.xlane.f32.xlu0 %v316_v60 }
 0x17b   : > { %v315_v3 = vpop.xlane.xlu1 %314  ;;  %v312_v7 = vpop.xlane.xlu0 %311 }
 0x17c   : > { %v327_v10 = vadd.f32 %v323_v62, %v315_v3  ;;  %v326_v11 = vadd.f32 %v322_v63, %v312_v7 }
 0x17e   : > { %v487_v14 = vmul.f32 -1.442695, %v327_v10  ;;  %v486_v15 = vmul.f32 -1.442695, %v326_v11 }
 0x17f   : > { %v321_v16 = vpop.xlane.xlu1 %320  ;;  %v318_v17 = vpop.xlane.xlu0 %317 }
 0x180   : > { %550 = vpow2.f32 %v487_v14  ;;  %v329_v18 = vadd.f32 %v325_v12, %v321_v16  ;;  %v328_v19 = vadd.f32 %v324_v13, %v318_v17 }
 0x181   : > { %552 = vpow2.f32 %v486_v15 }
 0x182   : > { %v489_v20 = vmul.f32 -1.442695, %v329_v18  ;;  %v488_v21 = vmul.f32 -1.442695, %v328_v19 }
 0x184   : > { %554 = vpow2.f32 %v489_v20 }
 0x185   : > { %556 = vpow2.f32 %v488_v21 }
 0x18a   : > { %v551_v22 = vpop.eup %550 }
 0x18b   : > { %v553_v23 = vpop.eup %552  ;;  %v343_v24 = vadd.f32 1.0, %v551_v22 }
 0x18c   : > { %v342_v25 = vadd.f32 1.0, %v553_v23 }
 0x18d   : > { %558 = vrcp.f32 %v343_v24 }
 0x18e   : > { %v555_v26 = vpop.eup %554  ;;  %560 = vrcp.f32 %v342_v25 }
 0x18f   : > { %v557_v27 = vpop.eup %556  ;;  %v345_v29 = vadd.f32 1.0, %v555_v26 }
 0x190   : > { %v344_v28 = vadd.f32 1.0, %v557_v27 }
 0x192   : > { %562 = vrcp.f32 %v344_v28 }
 0x193   : > { %564 = vrcp.f32 %v345_v29 }
 0x197   : > { %v559_v30 = vpop.eup %558 }
 0x198   : > { %v561_v31 = vpop.eup %560  ;;  %361 = vperm.xlu1 %549, %v559_v30  }
 0x199   : > { %356 = vperm.xlu0 %548, %v561_v31  }
 0x19c   : > { %v563_v32 = vpop.eup %562 }
 0x19d   : > { %366 = vperm.xlu1 %549, %v563_v32   ;;  %v565_v33 = vpop.eup %564 }
 0x1a1   : > { %371 = vperm.xlu1 %549, %v565_v33  }
 0x217   : > { %v362_v34 = vpop.permute.xlu1 %361 }
 0x218   : > { %v376_v35 = vmul.f32 %v362_v34, %v825_v5  ;;  %v377_v36 = vmul.f32 %v362_v34, %v827_v6  ;;  %v357_v37 = vpop.permute.xlu0 %356 }
 0x219   : > { %v374_v38 = vmul.f32 %v357_v37, %v815_v0  ;;  %v375_v39 = vmul.f32 %v357_v37, %v817_v1 }
 0x21a   : > { %384 = vst [vmem:[%s242_s26 + $0x10] sm:$0xff] %v376_v35  ;;  %385 = vst [vmem:[%s242_s26 + $0x18] sm:$0xff] %v377_v36 }
 0x21b   : > { %382 = vst [vmem:[%s242_s26] sm:$0xff] %v374_v38  ;;  %383 = vst [vmem:[%s242_s26 + $0x8] sm:$0xff] %v375_v39 }
 0x21c   : > { %v367_v40 = vpop.permute.xlu1 %366 }
 0x21d   : > { %v378_v41 = vmul.f32 %v367_v40, %v819_v2  ;;  %v379_v5 = vmul.f32 %v367_v40, %v823_v4 }
 0x21f   : > { %386 = vst [vmem:[%s242_s26 + $0x20] sm:$0xff] %v378_v41  ;;  %387 = vst [vmem:[%s242_s26 + $0x28] sm:$0xff] %v379_v5 }
 0x220   : > { %v372_v0 = vpop.permute.xlu1 %371 }
 0x221   : > { %v380_v1 = vmul.f32 %v372_v0, %v831_v8  ;;  %v381_v2 = vmul.f32 %v372_v0, %v833_v9 }
 0x223   : > { %388 = vst [vmem:[%s242_s26 + $0x30] sm:$0xff] %v380_v1  ;;  %389 = vst [vmem:[%s242_s26 + $0x38] sm:$0xff] %v381_v2 }
 0x224   : > { %609 = shalt.err (!%p606_p2)
}
 0x225   : > { %s610_s9 = scalar_lea.hbm %s900_s14, 1024  ;;  %s614_s13 = scalar_lea.hbm %s951_s5, 2048 }
 0x226   : > { %p611_p4 = scmp.ne.s32.totalorder %s900_s14, %s610_s9  ;;  %p615_p9 = scmp.lt.u32.totalorder %s900_s14, %s951_s5 }
 0x227   : > { %p616_p1 = scmp.lt.u32.totalorder %s614_s13, %s610_s9  ;;  %p618_p6 = scmp.lt.u32.totalorder %s610_s9, %s900_s14 }
 0x228   : > { %p612_p5 = pnand %p611_p4, %p958_p11 }
 0x229   : > { %p617_p3 = por %p616_p1, %p615_p9 }
 0x22a   : > { %p613_p7 = pneg %p612_p5 }
 0x22b   : > { %p619_p12 = por %p618_p6, %p617_p3 }
 0x22d   : > { %p620_p13 = pnand %p619_p12, %p613_p7 }
 0x22f   : > { %623 = shalt.err (!%p620_p13)
}
 0x230   : > { %s669_s29 = smov 256   ;;  %s670_s25 = smov 16  }
 0x231   : > { %499 = dma.vmem_to_hbm [thread:$0]  (%p958_p11), %s895_s28, 1024, %s900_s14, %s391_s22, %s669_s29, %s669_s29, %s670_s25  }
 0x232 PF: > { %s419_s12 = sand.u32 1, %s650_s18   ;;  %p959_p8 = scmp.ne.s32.totalorder %s956_s6, 0 }
 0x233   : > { %p960_p10 = scmp.ge.s32.totalorder %s662_s21, 2  ;;  %s420_s15 = scalar_lea.sflag [#allocation4], %s419_s12 }
 0x235   : > { %p506_p0 = pnand %p960_p10, %p959_p8 }
 0x237   : > { %645 = dma.done.wait (!%p506_p0), %s420_s15, 1024  }
 0x238   : > { %647 = vsyncadd (!%p506_p0), %s420_s15, 4294966272  ;;  %p18_p2 = scmp.ge.s32.totalorder %s726_s24, 4   ;;  %s961_s18 = smov %s654_s19 }
 0x239   : > { %s962_s19 = smov %s658_s20  ;;  %s963_s20 = smov %s738_s27 }
 0x23a   : > { %s964_s21 = smov %s726_s24  ;;  %20 = sbr.rel (!%p18_p2) target bundleno = 5 (0x5), region = 85 }
 0x241   :  { %425 = vsyncpa [#allocation3], 1 }
 0x242   :  { %427 = vsyncpa [#allocation3 + $0x1], 1 }
 0x243   :  { %428 = vsyncpa [#allocation4], 1 }
 0x244   :  { %430 = vsyncpa [#allocation4 + $0x1], 1 }

</bundles_post_ra>
